<compile_context>
chip_gen: v7x
topology: tpu7x:2x2x1
jax: 0.10.0
libtpu: 0.0.40
codegen_flags: <defaults>
</compile_context>

<pallas_src>
import math

import jax
import jax.numpy as jnp
from jax.experimental import pallas as pl
from jax.experimental.pallas import tpu as pltpu

_TB_MAX = 32                 # cap on the statically-unrolled per-step batch loop
_LANES_HARD_CAP = 512 * 1024 # sanity cap on lanes per grid step


def _round_up(v, m):
    return ((v + m - 1) // m) * m


def _sublane_pad(c, itemsize):
    """Channels padded to the dtype's sublane tile (8 f32 / 16 bf16 / 32 int8)."""
    unit = max(1, 32 // itemsize)
    return _round_up(c, unit)


def _vmem_budget():
    """(vmem_limit_bytes, tile_budget_bytes) derived from the chip's VMEM."""
    cap = 64 * 1024 * 1024  # conservative fallback (v7x-class per-core VMEM)
    try:
        info = pltpu.get_tpu_info()
        cap_attr = int(getattr(info, "vmem_capacity_bytes", 0))
        if cap_attr > 0:
            cap = cap_attr
    except Exception:
        pass
    # Scoped limit we request: half of physical, clamped to [32 MiB, 64 MiB]
    # (64 MiB on v5e/v6e, 32 MiB on v7x).
    vmem_limit = max(32 * 1024 * 1024, min(cap // 2, 64 * 1024 * 1024))
    # ~75% of that for the double-buffered streaming tiles (headroom for the
    # grid-invariant weight/bias buffers and compiler scratch).
    tile_budget = (vmem_limit * 3) // 4
    return vmem_limit, tile_budget


def _msd_final_spatial_kernel(x_ref, w_ref, b_ref, o_ref):
    # x_ref: (c_in, TN)  w_ref: (c_out, c_in)  b_ref: (c_out, 1) f32  o_ref: (c_out, TN)
    acc = jnp.dot(w_ref[...], x_ref[...], preferred_element_type=jnp.float32)
    o_ref[...] = (acc + b_ref[...]).astype(o_ref.dtype)


def _msd_final_batched_kernel(x_ref, w_ref, b_ref, o_ref):
    # x_ref: (TB, c_in, N)  w_ref: (c_out, c_in)  b_ref: (c_out, 1) f32  o_ref: (TB, c_out, N)
    w = w_ref[...]
    bias = b_ref[...]
    for t in range(x_ref.shape[0]):          # TB <= _TB_MAX, static unroll
        acc = jnp.dot(w, x_ref[t], preferred_element_type=jnp.float32)
        o_ref[t] = (acc + bias).astype(o_ref.dtype)


def msd_final_layer(x, weight, bias, *, max_lanes_per_step=None, max_batch_block=None):
    """Equivalent of MSDFinalLayer.forward.

    x:      (b, c_in, *size)
    weight: (c_out, c_in, 1)   (nn.Conv1d weight shape)
    bias:   (c_out,)
    returns (b, c_out, *size)
    """
    b, c_in = x.shape[0], x.shape[1]
    size = x.shape[2:]
    n = int(math.prod(size)) if size else 1
    c_out = weight.shape[0]

    # Weight cast to the activation dtype for the MXU; bias kept f32 so the add
    # happens against the f32 accumulator.
    w2d = weight.reshape(c_out, c_in).astype(x.dtype)
    b2d = bias.reshape(c_out, 1).astype(jnp.float32)
    xf = x.reshape(b, c_in, n)

    itemsize = jnp.dtype(x.dtype).itemsize
    vmem_limit, tile_budget = _vmem_budget()

    # Double-buffered input + output tiles per lane of the streamed axis.
    bytes_per_lane = 2 * (_sublane_pad(c_in, itemsize) + _sublane_pad(c_out, itemsize)) * itemsize
    lanes = max(128, min(_LANES_HARD_CAP, (tile_budget // bytes_per_lane) // 128 * 128))
    if max_lanes_per_step is not None:
        lanes = max(128, min(lanes, max(128, int(max_lanes_per_step)) // 128 * 128))

    n_pad = _round_up(n, 128)

    cost = pl.CostEstimate(
        flops=2 * b * c_out * c_in * n,
        transcendentals=0,
        bytes_accessed=(b * c_in * n + b * c_out * n + c_out * c_in + c_out) * itemsize,
    )

    use_batch_path = (b > 1) and (2 * n_pad <= lanes)

    if use_batch_path:
        # Small images, larger batch: block several batch elements per step so
        # per-step HBM traffic stays large.
        tb = min(b, _TB_MAX, max(1, lanes // n_pad))
        if max_batch_block is not None:
            tb = max(1, min(tb, int(max_batch_block)))
        # Keep at least 2 grid points so v7x's second TensorCore has work.
        if pl.cdiv(b, tb) < 2:
            tb = max(1, pl.cdiv(b, 2))
        grid = (pl.cdiv(b, tb),)

        out = pl.pallas_call(
            _msd_final_batched_kernel,
            out_shape=jax.ShapeDtypeStruct((b, c_out, n), x.dtype),
            grid_spec=pltpu.PrefetchScalarGridSpec(
                num_scalar_prefetch=0,
                grid=grid,
                in_specs=[
                    pl.BlockSpec((tb, c_in, n), lambda i: (i, 0, 0)),
                    # Constant block index: weight / bias are DMA'd once.
                    pl.BlockSpec((c_out, c_in), lambda i: (0, 0)),
                    pl.BlockSpec((c_out, 1), lambda i: (0, 0)),
                ],
                out_specs=pl.BlockSpec((tb, c_out, n), lambda i: (i, 0, 0)),
            ),
            compiler_params=pltpu.CompilerParams(
                dimension_semantics=("parallel",),
                vmem_limit_bytes=vmem_limit,
            ),
            cost_estimate=cost,
        )(xf, w2d, b2d)
    else:
        # Large flattened spatial size: stream big lane-dense spatial tiles.
        tn = min(lanes, n_pad)
        # Keep at least 2 grid points (dual TensorCores on v7x) when splittable.
        if b * pl.cdiv(n, tn) < 2 and n_pad >= 256:
            tn = _round_up(pl.cdiv(n, 2), 128)
        grid = (b, pl.cdiv(n, tn))

        out = pl.pallas_call(
            _msd_final_spatial_kernel,
            out_shape=jax.ShapeDtypeStruct((b, c_out, n), x.dtype),
            grid_spec=pltpu.PrefetchScalarGridSpec(
                num_scalar_prefetch=0,
                grid=grid,
                in_specs=[
                    # Squeeze the batch dim so the kernel works on 2D (c_in, TN).
                    pl.BlockSpec((pl.Squeezed(), c_in, tn), lambda i, j: (i, 0, j)),
                    pl.BlockSpec((c_out, c_in), lambda i, j: (0, 0)),
                    pl.BlockSpec((c_out, 1), lambda i, j: (0, 0)),
                ],
                out_specs=pl.BlockSpec((pl.Squeezed(), c_out, tn), lambda i, j: (i, 0, j)),
            ),
            compiler_params=pltpu.CompilerParams(
                dimension_semantics=("parallel", "parallel"),
                vmem_limit_bytes=vmem_limit,
            ),
            cost_estimate=cost,
        )(xf, w2d, b2d)

    return out.reshape(b, c_out, *size)


def _reference(x, weight, bias):
    b, c_in = x.shape[0], x.shape[1]
    size = x.shape[2:]
    n = int(math.prod(size))
    c_out = weight.shape[0]
    y = jnp.einsum("oc,bcn->bon", weight.reshape(c_out, c_in), x.reshape(b, c_in, n))
    y = y + bias[None, :, None]
    return y.reshape(b, c_out, *size).astype(x.dtype)


if __name__ == "__main__":
    key = jax.random.PRNGKey(0)
    kx1, kx2, kx3, kx4, kw, kb = jax.random.split(key, 6)

    c_in, c_out = 4, 3
    # Module __init__ zero-inits weight/bias; use nonzero params so the compute
    # path is actually exercised.
    weight = jax.random.normal(kw, (c_out, c_in, 1), dtype=jnp.float32)
    bias = jax.random.normal(kb, (c_out,), dtype=jnp.float32)

    # 1) Batch-blocked path: small 16x16 images, several batch elements / step.
    x1 = jax.random.normal(kx1, (8, c_in, 16, 16), dtype=jnp.float32)
    out1 = jax.block_until_ready(msd_final_layer(x1, weight, bias))
    assert out1.shape == (8, c_out, 16, 16)
    assert jnp.allclose(out1, _reference(x1, weight, bias), atol=1e-5, rtol=1e-5)

    # 2) Ragged batch tile (b not divisible by the batch block).
    x2 = jax.random.normal(kx2, (5, c_in, 16, 16), dtype=jnp.float32)
    out2 = jax.block_until_ready(msd_final_layer(x2, weight, bias, max_batch_block=2))
    assert jnp.allclose(out2, _reference(x2, weight, bias), atol=1e-5, rtol=1e-5)

    # 3) Spatial-tiled path (b=1): >=2 spatial tiles + ragged last tile.
    x3 = jax.random.normal(kx3, (1, c_in, 16, 40), dtype=jnp.float32)
    out3 = jax.block_until_ready(msd_final_layer(x3, weight, bias))
    assert jnp.allclose(out3, _reference(x3, weight, bias), atol=1e-5, rtol=1e-5)
    out3b = jax.block_until_ready(msd_final_layer(x3, weight, bias, max_lanes_per_step=256))
    assert jnp.allclose(out3b, _reference(x3, weight, bias), atol=1e-5, rtol=1e-5)

    # 4) Sub-128 spatial extent (fully masked lane tail).
    x4 = jax.random.normal(kx4, (1, c_in, 5, 7), dtype=jnp.float32)
    out4 = jax.block_until_ready(msd_final_layer(x4, weight, bias))
    assert jnp.allclose(out4, _reference(x4, weight, bias), atol=1e-5, rtol=1e-5)

    # 5) Module default: zero-initialized weight/bias -> zero output.
    out0 = jax.block_until_ready(
        msd_final_layer(x1, jnp.zeros((c_out, c_in, 1), jnp.float32),
                        jnp.zeros((c_out,), jnp.float32)))
    assert jnp.allclose(out0, jnp.zeros_like(out0))

    print("KERNEL_OK")
</pallas_src>

<mosaic_0001>
module attributes {stable_mosaic.version = 11 : i64} {
  func.func @_msd_final_batched_kernel(%arg0: i32, %arg1: memref<4x4x256xf32, #tpu.memory_space<vmem>>, %arg2: memref<3x4xf32, #tpu.memory_space<vmem>>, %arg3: memref<3x1xf32, #tpu.memory_space<vmem>>, %arg4: memref<4x3x256xf32, #tpu.memory_space<vmem>>) attributes {dimension_semantics = [#tpu.dimension_semantics<parallel>], iteration_bounds = array<i64: 2>, scalar_prefetch = 0 : i64, scratch_operands = 0 : i64, tpu.core_type = #tpu.core_type<tc>, window_params = [{transform_indices = @transform_0, window_bounds = array<i64: 4, 4, 256>}, {pipeline_mode = #tpu.pipeline_mode<synchronous>, transform_indices = @transform_1, window_bounds = array<i64: 3, 4>}, {pipeline_mode = #tpu.pipeline_mode<synchronous>, transform_indices = @transform_2, window_bounds = array<i64: 3, 1>}, {transform_indices = @transform_3, window_bounds = array<i64: 4, 3, 256>}]} {
    %c0 = arith.constant 0 : index
    %c0_0 = arith.constant 0 : index
    %0 = vector.load %arg2[%c0, %c0_0] : memref<3x4xf32, #tpu.memory_space<vmem>>, vector<3x4xf32>
    %c0_1 = arith.constant 0 : index
    %c0_2 = arith.constant 0 : index
    %1 = vector.load %arg3[%c0_1, %c0_2] : memref<3x1xf32, #tpu.memory_space<vmem>>, vector<3x1xf32>
    %c0_3 = arith.constant 0 : index
    %c0_4 = arith.constant 0 : index
    %c0_5 = arith.constant 0 : index
    %2 = vector.load %arg1[%c0_3, %c0_4, %c0_5] : memref<4x4x256xf32, #tpu.memory_space<vmem>>, vector<1x4x256xf32>
    %3 = vector.shape_cast %2 : vector<1x4x256xf32> to vector<4x256xf32>
    %cst = arith.constant dense<0.000000e+00> : vector<3x256xf32>
    %4 = tpu.matmul %0, %3, %cst {dimension_numbers = #tpu.dot_dimension_numbers<[1], [0], [0], [1], [0, 0, 1, 1], [], []>} : vector<3x4xf32>, vector<4x256xf32>, vector<3x256xf32> -> vector<3x256xf32>
    %5 = vector.broadcast %1 : vector<3x1xf32> to vector<3x256xf32>
    %6 = arith.addf %4, %5 : vector<3x256xf32>
    %c0_6 = arith.constant 0 : index
    %c0_7 = arith.constant 0 : index
    %c0_8 = arith.constant 0 : index
    %7 = vector.load %arg4[%c0_6, %c0_7, %c0_8] : memref<4x3x256xf32, #tpu.memory_space<vmem>>, vector<1x3x256xf32>
    %8 = vector.shape_cast %7 : vector<1x3x256xf32> to vector<3x256xf32>
    %9 = vector.shape_cast %6 : vector<3x256xf32> to vector<1x3x256xf32>
    tpu.vector_store %arg4[%c0_6, %c0_7, %c0_8], %9 {strides = array<i32>} : memref<4x3x256xf32, #tpu.memory_space<vmem>>, vector<1x3x256xf32>,
    %c1 = arith.constant 1 : index
    %c0_9 = arith.constant 0 : index
    %c0_10 = arith.constant 0 : index
    %10 = vector.load %arg1[%c1, %c0_9, %c0_10] : memref<4x4x256xf32, #tpu.memory_space<vmem>>, vector<1x4x256xf32>
    %11 = vector.shape_cast %10 : vector<1x4x256xf32> to vector<4x256xf32>
    %cst_11 = arith.constant dense<0.000000e+00> : vector<3x256xf32>
    %12 = tpu.matmul %0, %11, %cst_11 {dimension_numbers = #tpu.dot_dimension_numbers<[1], [0], [0], [1], [0, 0, 1, 1], [], []>} : vector<3x4xf32>, vector<4x256xf32>, vector<3x256xf32> -> vector<3x256xf32>
    %13 = vector.broadcast %1 : vector<3x1xf32> to vector<3x256xf32>
    %14 = arith.addf %12, %13 : vector<3x256xf32>
    %c1_12 = arith.constant 1 : index
    %c0_13 = arith.constant 0 : index
    %c0_14 = arith.constant 0 : index
    %15 = vector.load %arg4[%c1_12, %c0_13, %c0_14] : memref<4x3x256xf32, #tpu.memory_space<vmem>>, vector<1x3x256xf32>
    %16 = vector.shape_cast %15 : vector<1x3x256xf32> to vector<3x256xf32>
    %17 = vector.shape_cast %14 : vector<3x256xf32> to vector<1x3x256xf32>
    tpu.vector_store %arg4[%c1_12, %c0_13, %c0_14], %17 {strides = array<i32>} : memref<4x3x256xf32, #tpu.memory_space<vmem>>, vector<1x3x256xf32>,
    %c2 = arith.constant 2 : index
    %c0_15 = arith.constant 0 : index
    %c0_16 = arith.constant 0 : index
    %18 = vector.load %arg1[%c2, %c0_15, %c0_16] : memref<4x4x256xf32, #tpu.memory_space<vmem>>, vector<1x4x256xf32>
    %19 = vector.shape_cast %18 : vector<1x4x256xf32> to vector<4x256xf32>
    %cst_17 = arith.constant dense<0.000000e+00> : vector<3x256xf32>
    %20 = tpu.matmul %0, %19, %cst_17 {dimension_numbers = #tpu.dot_dimension_numbers<[1], [0], [0], [1], [0, 0, 1, 1], [], []>} : vector<3x4xf32>, vector<4x256xf32>, vector<3x256xf32> -> vector<3x256xf32>
    %21 = vector.broadcast %1 : vector<3x1xf32> to vector<3x256xf32>
    %22 = arith.addf %20, %21 : vector<3x256xf32>
    %c2_18 = arith.constant 2 : index
    %c0_19 = arith.constant 0 : index
    %c0_20 = arith.constant 0 : index
    %23 = vector.load %arg4[%c2_18, %c0_19, %c0_20] : memref<4x3x256xf32, #tpu.memory_space<vmem>>, vector<1x3x256xf32>
    %24 = vector.shape_cast %23 : vector<1x3x256xf32> to vector<3x256xf32>
    %25 = vector.shape_cast %22 : vector<3x256xf32> to vector<1x3x256xf32>
    tpu.vector_store %arg4[%c2_18, %c0_19, %c0_20], %25 {strides = array<i32>} : memref<4x3x256xf32, #tpu.memory_space<vmem>>, vector<1x3x256xf32>,
    %c3 = arith.constant 3 : index
    %c0_21 = arith.constant 0 : index
    %c0_22 = arith.constant 0 : index
    %26 = vector.load %arg1[%c3, %c0_21, %c0_22] : memref<4x4x256xf32, #tpu.memory_space<vmem>>, vector<1x4x256xf32>
    %27 = vector.shape_cast %26 : vector<1x4x256xf32> to vector<4x256xf32>
    %cst_23 = arith.constant dense<0.000000e+00> : vector<3x256xf32>
    %28 = tpu.matmul %0, %27, %cst_23 {dimension_numbers = #tpu.dot_dimension_numbers<[1], [0], [0], [1], [0, 0, 1, 1], [], []>} : vector<3x4xf32>, vector<4x256xf32>, vector<3x256xf32> -> vector<3x256xf32>
    %29 = vector.broadcast %1 : vector<3x1xf32> to vector<3x256xf32>
    %30 = arith.addf %28, %29 : vector<3x256xf32>
    %c3_24 = arith.constant 3 : index
    %c0_25 = arith.constant 0 : index
    %c0_26 = arith.constant 0 : index
    %31 = vector.load %arg4[%c3_24, %c0_25, %c0_26] : memref<4x3x256xf32, #tpu.memory_space<vmem>>, vector<1x3x256xf32>
    %32 = vector.shape_cast %31 : vector<1x3x256xf32> to vector<3x256xf32>
    %33 = vector.shape_cast %30 : vector<3x256xf32> to vector<1x3x256xf32>
    tpu.vector_store %arg4[%c3_24, %c0_25, %c0_26], %33 {strides = array<i32>} : memref<4x3x256xf32, #tpu.memory_space<vmem>>, vector<1x3x256xf32>,
    return
  }
  func.func @transform_0(%arg0: i32) -> (i32, i32, i32) {
    %c0_i32 = arith.constant 0 : i32
    %c0_i32_0 = arith.constant 0 : i32
    %c0_i32_1 = arith.constant 0 : i32
    return %arg0, %c0_i32, %c0_i32_0 : i32, i32, i32
  }
  func.func @transform_1(%arg0: i32) -> (i32, i32) {
    %c0_i32 = arith.constant 0 : i32
    %c0_i32_0 = arith.constant 0 : i32
    %c0_i32_1 = arith.constant 0 : i32
    return %c0_i32, %c0_i32_0 : i32, i32
  }
  func.func @transform_2(%arg0: i32) -> (i32, i32) {
    %c0_i32 = arith.constant 0 : i32
    %c0_i32_0 = arith.constant 0 : i32
    %c0_i32_1 = arith.constant 0 : i32
    return %c0_i32, %c0_i32_0 : i32, i32
  }
  func.func @transform_3(%arg0: i32) -> (i32, i32, i32) {
    %c0_i32 = arith.constant 0 : i32
    %c0_i32_0 = arith.constant 0 : i32
    %c0_i32_1 = arith.constant 0 : i32
    return %arg0, %c0_i32, %c0_i32_0 : i32, i32, i32
  }
}

</mosaic_0001>

<bundles_post_ra>
// kernel: tpu_custom_call.1
= control target key start
LH: loop header
LB: loop body
LE: loop exit
PB: predicated region body
PF: predicated region fallthrough
CT: control target
= control target key end

     0   :  { %8 = vsyncpa [#allocation3], 0  ;;  %s915_s0 = inlined_call_operand.hbm [shape: f32[8,4,256], index: 0, kind: input, shape index: {}]   ;;  %s916_s1 = inlined_call_operand.vmem [shape: f32[3,4], index: 1, kind: input, shape index: {}]   ;;  %s917_s2 = inlined_call_operand.vmem [shape: f32[3,1], index: 2, kind: input, shape index: {}]   ;;  %s918_s3 = inlined_call_operand.vmem [shape: f32[8,3,256], index: 3, kind: output, shape index: {}]  }
   0x1   :  { %10 = vsyncpa [#allocation3 + $0x1], 0  ;;  %s790_s12 = smov 0   ;;  %s792_s13 = smov 0  }
   0x2   :  { %s794_s14 = smov 0   ;;  %s796_s15 = smov 0  }
   0x3 LB: > { %s615_s16 = sadd.s32 4294967295, %s763_s15   ;;  %s810_s17 = sadd.s32 1, %s763_s15   ;;  %s763_s15 = sphi %s796_s15, %s925_s15   ;;  %s759_s14 = sphi %s794_s14, %s924_s14   ;;  %s755_s13 = sphi %s792_s13, %s923_s13   ;;  %s751_s12 = sphi %s790_s12, %s922_s12  }
   0x4   : > { %s20_s18 = ssub.s32 %s763_s15, %s810_s17  ;;  %s23_s19 = sadd.s32 1, %s759_s14 }
   0x5   : > { %p21_p0 = scmp.eq.s32.totalorder %s20_s18, 0  ;;  %p30_p1 = scmp.ne.s32.totalorder %s759_s14, %s755_s13 }
   0x6   : > { %p31_p2 = scmp.eq.s32.totalorder %s763_s15, 0  ;;  %p36_p3 = scmp.ne.s32.totalorder %s755_s13, %s751_s12 }
   0x7   : > { %s820_s20 = scalar_select %p21_p0, %s759_s14, %s23_s19  }
   0x8   : > { %p32_p4 = por %p31_p2, %p30_p1  ;;  %p37_p5 = scmp.eq.s32.totalorder %s615_s16, 0 }
   0x9   : > { %p657_p6 = scmp.lt.s32.totalorder %s763_s15, 2  ;;  %s134_s22 = sand.u32 1, %s759_s14  }
   0xa   : > { %p825_p7 = por %p37_p5, %p36_p3  ;;  %s619_s23 = sshll.u32 %s134_s22, 5 }
   0xb   : > { %s649_s24 = sshll.u32 %s763_s15, 9  ;;  %s138_s28 = scalar_lea.vmem [#allocation2], %s619_s23 }
   0xc   : > { %s834_s27 = scalar_lea.hbm %s915_s0, %s649_s24  ;;  %s146_s29 = sshll.u32 %s138_s28, 4  ;;  %s836_s29 = int_to_ptr.vmem [resolvable:$true] %s146_s29 }
   0xd   : > { %p838_p8 = pnand %p657_p6, %p32_p4  ;;  %s843_s4 = scalar_lea.sflag [#allocation3], %s134_s22 }
   0xe   : > { %s699_s5 = scalar_lea.hbm %s834_s27, 512  ;;  %s704_s8 = scalar_lea.hbm %s915_s0, 1024 }
   0xf   : > { %p700_p10 = scmp.ne.s32.totalorder %s834_s27, %s699_s5  ;;  %p701_p11 = pneg %p838_p8 }
  0x10   : > { %p705_p0 = scmp.lt.u32.totalorder %s834_s27, %s915_s0  ;;  %p706_p1 = scmp.lt.u32.totalorder %s704_s8, %s699_s5 }
  0x11   : > { %p702_p12 = pnand %p701_p11, %p700_p10  ;;  %p708_p3 = scmp.lt.u32.totalorder %s699_s5, %s834_s27 }
  0x12   : > { %p707_p2 = por %p706_p1, %p705_p0 }
  0x13   : > { %p703_p13 = pneg %p702_p12 }
  0x14   : > { %p709_p4 = por %p708_p3, %p707_p2 }
  0x16   : > { %p710_p5 = pnand %p709_p4, %p703_p13 }
  0x18   : > { %713 = shalt.err (!%p710_p5)
}
  0x19   : > { %s714_s11 = scalar_lea.vmem %s836_s29, 512  ;;  %s765_s12 = smov [#allocation2]  }
  0x1a   : > { %p715_p6 = scmp.ne.s32.totalorder %s836_s29, %s714_s11  ;;  %s719_s18 = sshll.u32 %s765_s12, 4  ;;  %s720_s18 = int_to_ptr.vmem [resolvable:$false] %s719_s18 }
  0x1b   : > { %s721_s19 = scalar_lea.vmem %s720_s18, 1024  ;;  %p722_p9 = scmp.lt.s32.totalorder %s836_s29, %s720_s18 }
  0x1c   : > { %p717_p10 = pnand %p715_p6, %p701_p11  ;;  %p723_p0 = scmp.lt.s32.totalorder %s721_s19, %s714_s11 }
  0x1e   : > { %p718_p12 = pneg %p717_p10  ;;  %p724_p1 = por %p723_p0, %p722_p9 }
  0x20   : > { %p725_p2 = pnand %p724_p1, %p718_p12 }
  0x22   : > { %728 = shalt.err (!%p725_p2)
}
  0x23   : > { %s766_s22 = smov 128   ;;  %s767_s23 = smov 8  }
  0x24   : > { %656 = dma.hbm_to_vmem [thread:$0]  (!%p838_p8), %s834_s27, 512, %s836_s29, %s843_s4, %s766_s22, %s766_s22, %s767_s23  }
  0x25   : > { %p154_p11 = scmp.lt.s32.totalorder %s763_s15, 3  ;;  %p921_p13 = scmp.ge.s32.totalorder %s763_s15, 1 }
  0x27   : > { %p155_p3 = pnand %p921_p13, %p154_p11 }
  0x28   : > { %s160_s24 = sand.u32 (!%p155_p3), 1, %s755_s13  }
  0x29   : > { %158 = sbr.rel (%p155_p3) target bundleno = 277 (0x115), region = 32  ;;  %s624_s25 = sshll.u32 (!%p155_p3), %s160_s24, 5 }
  0x2a   : > { %s161_s26 = scalar_lea.sflag (!%p155_p3), [#allocation3], %s160_s24  ;;  %s164_s28 = scalar_lea.vmem (!%p155_p3), [#allocation2], %s624_s25 }
  0x30   : > { %746 = dma.done.wait (%p825_p7), %s161_s26, 512  }
  0x31   : > { %748 = vsyncadd (%p825_p7), %s161_s26, 4294966784  ;;  %v768_v0 = vmov 0.0   ;;  %v769_v1 = vmov 0   ;;  %v198_v2 = vld [vmem:[%s164_s28] sm:$0xff]  ;;  %vm210_vm0 = vcmask 1043456   ;;  %v631_v3 = vld [vmem:[%s164_s28 + $0x8] sm:$0xff] }
  0x32   : > { %279 = vmatprep.mubr.f32.mxu0 %v768_v0  ;;  %363 = vmatprep.mubr.f32.mxu1 %v768_v0  ;;  %v205_v4 = vcombine.high %v198_v2, %v198_v2  ;;  %v294_v5 = vcombine.high %v631_v3, %v631_v3  ;;  %v636_v6 = vld [vmem:[%s164_s28 + $0x10] sm:$0xff]  ;;  %v641_v7 = vld [vmem:[%s164_s28 + $0x18] sm:$0xff]  ;;  %v197_v8 = vld [vmem:[%s917_s2] sm:$0x7]  ;;  %vm206_vm1 = vcmask 31744   ;;  %s625_s21 = sshll.u32 %s615_s16, 2 }
  0x33   : > { %694 = vset.pattern.permute.xlu0 %v769_v1  ;;  %v196_v9 = vld [vmem:[%s916_s1] sm:$0x7]  ;;  %v379_v10 = vcombine.high %v636_v6, %v636_v6  ;;  %v464_v11 = vcombine.high %v641_v7, %v641_v7  ;;  %p190_p7 = scmp.lt.s32.totalorder %s625_s21, 7 }
  0x34   : > { %201 = vperm.xlu0 %694, %v197_v8   ;;  %628 = vmatprep.subr.msk.mxu0 %vm210_vm0, %v205_v4 }
  0x35   : > { %632 = vmatprep.subr.msk.mxu1 %vm210_vm0, %v294_v5  ;;  %629 = vmatpush1.msk.msra.mxu0 %vm210_vm0, %v198_v2  ;;  %s927_s21 = smov (!%p190_p7, %s625_s21), 7 }
  0x36   : > { %633 = vmatpush1.msk.msra.mxu1 %vm210_vm0, %v631_v3  ;;  %630 = vmatmul.mubr.msk.f32.vlgmr.msra.gmra.mrb[0].mxu0 %vm206_vm1, %v196_v9  ;;  %s650_s5 = sshll.u32 %s927_s21, 3 }
  0x37   : > { %634 = vmatmul.mubr.msk.f32.vlgmr.msra.gmra.mrb[0].mxu1 %vm206_vm1, %v196_v9  ;;  %637 = vmatprep.subr.msk.mxu0 %vm210_vm0, %v379_v10  ;;  %s194_s8 = scalar_lea.vmem %s918_s3, %s650_s5 }
  0x38   : > { %642 = vmatprep.subr.msk.mxu1 %vm210_vm0, %v464_v11  ;;  %638 = vmatpush1.msk.msra.mxu0 %vm210_vm0, %v636_v6 }
  0x39   : > { %643 = vmatpush1.msk.msra.mxu1 %vm210_vm0, %v641_v7  ;;  %448 = vmatprep.mubr.f32.mxu0 %v768_v0 }
  0x3a   : > { %533 = vmatprep.mubr.f32.mxu1 %v768_v0  ;;  %639 = vmatmul.mubr.msk.f32.vlgmr.msra.gmra.mrb[2].mxu0 %vm206_vm1, %v196_v9 }
  0x3b   : > { %644 = vmatmul.mubr.msk.f32.vlgmr.msra.gmra.mrb[2].mxu1 %vm206_vm1, %v196_v9 }
  0xb3   : > { %v202_v12 = vpop.permute.xlu0 %201 }
 0x109   : > { %v281_v13 = vpop.f32.mrb[0].mxu0 }
 0x10a   : > { %v365_v14 = vpop.f32.mrb[0].mxu1  ;;  %v282_v15 = vadd.f32 %v281_v13, %v202_v12  ;;  %v283_v16 = vpop.f32.mrb[1].mxu0 }
 0x10b   : > { %v366_v17 = vadd.f32 %v365_v14, %v202_v12  ;;  %v367_v18 = vpop.f32.mrb[1].mxu1  ;;  %v284_v19 = vadd.f32 %v283_v16, %v202_v12 }
 0x10c   : > { %v368_v20 = vadd.f32 %v367_v18, %v202_v12 }
 0x10d   : > { %v288_v21 = vcombine.low %v282_v15, %v284_v19  ;;  %v450_v23 = vpop.f32.mrb[2].mxu0 }
 0x10e   : > { %v372_v22 = vcombine.low %v366_v17, %v368_v20  ;;  %v535_v24 = vpop.f32.mrb[2].mxu1  ;;  %v451_v25 = vadd.f32 %v450_v23, %v202_v12  ;;  %v452_v27 = vpop.f32.mrb[3].mxu0 }
 0x10f   : > { %v536_v26 = vadd.f32 %v535_v24, %v202_v12  ;;  %v537_v28 = vpop.f32.mrb[3].mxu1  ;;  %290 = vst [vmem:[%s194_s8] sm:$0x77] %v288_v21  ;;  %v453_v29 = vadd.f32 %v452_v27, %v202_v12 }
 0x110   : > { %v538_v30 = vadd.f32 %v537_v28, %v202_v12  ;;  %635 = vst [vmem:[%s194_s8 + $0x8] sm:$0x77] %v372_v22 }
 0x111   : > { %v457_v31 = vcombine.low %v451_v25, %v453_v29 }
 0x112   : > { %v542_v32 = vcombine.low %v536_v26, %v538_v30 }
 0x113   : > { %640 = vst [vmem:[%s194_s8 + $0x10] sm:$0x77] %v457_v31 }
 0x114   : > { %645 = vst [vmem:[%s194_s8 + $0x18] sm:$0x77] %v542_v32 }
 0x115 PF: > { %p13_p8 = scmp.ge.s32.totalorder %s810_s17, 4   ;;  %s922_s12 = smov %s755_s13 }
 0x116   : > { %s923_s13 = smov %s759_s14  ;;  %s924_s14 = smov %s820_s20 }
 0x117   : > { %s925_s15 = smov %s810_s17  ;;  %15 = sbr.rel (!%p13_p8) target bundleno = 3 (0x3), region = 78 }
 0x11e   :  { %570 = vsyncpa [#allocation3], 1 }
 0x11f   :  { %572 = vsyncpa [#allocation3 + $0x1], 1 }

</bundles_post_ra>
